<compile_context>
chip_gen: v6e
topology: v6e:2x2x1
jax: 0.10.0
libtpu: 0.0.40
codegen_flags: <defaults>
</compile_context>

<pallas_src>
import jax
import jax.numpy as jnp
from jax.experimental import pallas as pl
from jax.experimental.pallas import tpu as pltpu


def _conv_bn_relu_kernel(x_ref, w_ref, b_ref, o_ref):
    # x_ref: (K, PT)     im2col columns (K = 9*C_in), pixels on the lane axis
    # w_ref: (C_out, K)  BN-scale-folded conv weight (resident, constant index_map)
    # b_ref: (C_out, 1)  BN bias
    # o_ref: (C_out, PT) lane-dense output tile
    acc = jnp.dot(w_ref[...], x_ref[...], preferred_element_type=jnp.float32)
    o_ref[...] = jnp.maximum(acc + b_ref[...], 0.0).astype(o_ref.dtype)


def conv3x3_bn_relu(x, w, gamma, beta, mean, var, *, stride, eps=1e-5,
                    max_pixel_tile=1024):
    """Fused Conv2d(k=3, pad=1, stride, bias=False) + BatchNorm2d(eval) + ReLU.

    x: (N, C_in, H, W) f32; w: (C_out, C_in, 3, 3) f32; BN params: (C_out,) f32.
    Returns (N, C_out, Ho, Wo) f32.
    """
    N, C_in, H, W = x.shape
    C_out = w.shape[0]
    Ho = (H - 1) // stride + 1
    Wo = (W - 1) // stride + 1
    P = Ho * Wo
    K = 9 * C_in

    # ---- fold BN (inference mode) into weight scale + bias -------------------
    scale = gamma / jnp.sqrt(var + eps)                    # (C_out,)
    bias = (beta - mean * scale).reshape(C_out, 1)         # (C_out, 1)
    w_f = w * scale[:, None, None, None]                   # (C_out, C_in, 3, 3)
    # flatten to (C_out, K) with index order (kh, kw, c) to match `cols` below
    w2 = jnp.transpose(w_f, (0, 2, 3, 1)).reshape(C_out, K)

    # ---- im2col: channels-first, pixels flattened on the last (lane) axis ----
    xp = jnp.pad(x, ((0, 0), (0, 0), (1, 1), (1, 1)))
    taps = []
    for kh in range(3):
        for kw in range(3):
            taps.append(xp[:, :, kh:kh + stride * Ho:stride,
                               kw:kw + stride * Wo:stride])  # (N, C_in, Ho, Wo)
    cols = jnp.stack(taps, axis=1).reshape(N, K, P)          # (N, K, Ho*Wo)

    # ---- pixel tiling (single large tile at toy sizes) ------------------------
    pt = min(P, max_pixel_tile)
    n_pt = -(-P // pt)
    P_pad = n_pt * pt
    if P_pad != P:
        cols = jnp.pad(cols, ((0, 0), (0, 0), (0, P_pad - P)))

    out_flat = pl.pallas_call(
        _conv_bn_relu_kernel,
        out_shape=jax.ShapeDtypeStruct((N, C_out, P_pad), jnp.float32),
        grid_spec=pltpu.PrefetchScalarGridSpec(
            num_scalar_prefetch=0,
            grid=(N, n_pt),
            in_specs=[
                pl.BlockSpec((None, K, pt), lambda n, p: (n, 0, p)),
                pl.BlockSpec((C_out, K), lambda n, p: (0, 0)),
                pl.BlockSpec((C_out, 1), lambda n, p: (0, 0)),
            ],
            out_specs=pl.BlockSpec((None, C_out, pt), lambda n, p: (n, 0, p)),
        ),
        compiler_params=pltpu.CompilerParams(
            dimension_semantics=("parallel", "parallel")),
    )(cols, w2, bias)

    return out_flat[:, :, :P].reshape(N, C_out, Ho, Wo)


def encoder_block_forward(x, params):
    """EncoderBlock forward: conv3x3/s2 + BN + ReLU -> conv3x3/s1 + BN + ReLU."""
    y = conv3x3_bn_relu(x, params["w1"], params["g1"], params["b1"],
                        params["m1"], params["v1"], stride=2)
    y = conv3x3_bn_relu(y, params["w2"], params["g2"], params["b2"],
                        params["m2"], params["v2"], stride=1)
    return y


def _ref_conv_bn_relu(x, w, gamma, beta, mean, var, stride, eps=1e-5):
    y = jax.lax.conv_general_dilated(
        x, w, window_strides=(stride, stride), padding=((1, 1), (1, 1)),
        dimension_numbers=("NCHW", "OIHW", "NCHW"))
    scale = gamma / jnp.sqrt(var + eps)
    y = y * scale[None, :, None, None] + (beta - mean * scale)[None, :, None, None]
    return jnp.maximum(y, 0.0)


if __name__ == "__main__":
    key = jax.random.PRNGKey(0)
    ks = jax.random.split(key, 11)
    N, C_in, C_out, H, W = 2, 4, 8, 16, 16
    x = jax.random.normal(ks[0], (N, C_in, H, W), dtype=jnp.float32)
    params = dict(
        w1=0.1 * jax.random.normal(ks[1], (C_out, C_in, 3, 3), jnp.float32),
        g1=1.0 + 0.1 * jax.random.normal(ks[2], (C_out,), jnp.float32),
        b1=0.1 * jax.random.normal(ks[3], (C_out,), jnp.float32),
        m1=0.1 * jax.random.normal(ks[4], (C_out,), jnp.float32),
        v1=jax.random.uniform(ks[5], (C_out,), jnp.float32, 0.5, 1.5),
        w2=0.1 * jax.random.normal(ks[6], (C_out, C_out, 3, 3), jnp.float32),
        g2=1.0 + 0.1 * jax.random.normal(ks[7], (C_out,), jnp.float32),
        b2=0.1 * jax.random.normal(ks[8], (C_out,), jnp.float32),
        m2=0.1 * jax.random.normal(ks[9], (C_out,), jnp.float32),
        v2=jax.random.uniform(ks[10], (C_out,), jnp.float32, 0.5, 1.5),
    )

    out = encoder_block_forward(x, params)
    out = jax.block_until_ready(out)

    ref = _ref_conv_bn_relu(x, params["w1"], params["g1"], params["b1"],
                            params["m1"], params["v1"], stride=2)
    ref = _ref_conv_bn_relu(ref, params["w2"], params["g2"], params["b2"],
                            params["m2"], params["v2"], stride=1)

    assert out.shape == (N, C_out, H // 2, W // 2), out.shape
    assert jnp.allclose(out, ref, atol=1e-4, rtol=1e-4), \
        float(jnp.max(jnp.abs(out - ref)))
    print("KERNEL_OK")
</pallas_src>

<mosaic_0001>
module attributes {stable_mosaic.version = 11 : i64} {
  func.func @_conv_bn_relu_kernel(%arg0: i32, %arg1: i32, %arg2: memref<1x36x64xf32, #tpu.memory_space<vmem>>, %arg3: memref<8x36xf32, #tpu.memory_space<vmem>>, %arg4: memref<8x1xf32, #tpu.memory_space<vmem>>, %arg5: memref<1x8x64xf32, #tpu.memory_space<vmem>>) attributes {dimension_semantics = [#tpu.dimension_semantics<parallel>, #tpu.dimension_semantics<parallel>], iteration_bounds = array<i64: 2, 1>, scalar_prefetch = 0 : i64, scratch_operands = 0 : i64, tpu.core_type = #tpu.core_type<tc>, window_params = [{transform_indices = @transform_0, window_bounds = array<i64: 1, 36, 64>}, {pipeline_mode = #tpu.pipeline_mode<synchronous>, transform_indices = @transform_1, window_bounds = array<i64: 8, 36>}, {pipeline_mode = #tpu.pipeline_mode<synchronous>, transform_indices = @transform_2, window_bounds = array<i64: 8, 1>}, {transform_indices = @transform_3, window_bounds = array<i64: 1, 8, 64>}]} {
    %c0 = arith.constant 0 : index
    %c0_0 = arith.constant 0 : index
    %0 = vector.load %arg3[%c0, %c0_0] : memref<8x36xf32, #tpu.memory_space<vmem>>, vector<8x36xf32>
    %c0_1 = arith.constant 0 : index
    %c0_2 = arith.constant 0 : index
    %c0_3 = arith.constant 0 : index
    %1 = vector.load %arg2[%c0_1, %c0_2, %c0_3] : memref<1x36x64xf32, #tpu.memory_space<vmem>>, vector<1x36x64xf32>
    %2 = vector.shape_cast %1 : vector<1x36x64xf32> to vector<36x64xf32>
    %cst = arith.constant dense<0.000000e+00> : vector<8x64xf32>
    %3 = tpu.matmul %0, %2, %cst {dimension_numbers = #tpu.dot_dimension_numbers<[1], [0], [0], [1], [0, 0, 1, 1], [], []>} : vector<8x36xf32>, vector<36x64xf32>, vector<8x64xf32> -> vector<8x64xf32>
    %c0_4 = arith.constant 0 : index
    %c0_5 = arith.constant 0 : index
    %4 = vector.load %arg4[%c0_4, %c0_5] : memref<8x1xf32, #tpu.memory_space<vmem>>, vector<8x1xf32>
    %5 = vector.broadcast %4 : vector<8x1xf32> to vector<8x64xf32>
    %6 = arith.addf %3, %5 : vector<8x64xf32>
    %cst_6 = arith.constant 0.000000e+00 : f32
    %7 = vector.broadcast %cst_6 : f32 to vector<8x64xf32>
    %8 = arith.maximumf %6, %7 : vector<8x64xf32>
    %c0_7 = arith.constant 0 : index
    %c0_8 = arith.constant 0 : index
    %c0_9 = arith.constant 0 : index
    %9 = vector.load %arg5[%c0_7, %c0_8, %c0_9] : memref<1x8x64xf32, #tpu.memory_space<vmem>>, vector<1x8x64xf32>
    %10 = vector.shape_cast %9 : vector<1x8x64xf32> to vector<8x64xf32>
    %11 = vector.shape_cast %8 : vector<8x64xf32> to vector<1x8x64xf32>
    tpu.vector_store %arg5[%c0_7, %c0_8, %c0_9], %11 {strides = array<i32>} : memref<1x8x64xf32, #tpu.memory_space<vmem>>, vector<1x8x64xf32>,
    return
  }
  func.func @transform_0(%arg0: i32, %arg1: i32) -> (i32, i32, i32) {
    %c0_i32 = arith.constant 0 : i32
    %c0_i32_0 = arith.constant 0 : i32
    return %arg0, %c0_i32, %arg1 : i32, i32, i32
  }
  func.func @transform_1(%arg0: i32, %arg1: i32) -> (i32, i32) {
    %c0_i32 = arith.constant 0 : i32
    %c0_i32_0 = arith.constant 0 : i32
    %c0_i32_1 = arith.constant 0 : i32
    return %c0_i32, %c0_i32_0 : i32, i32
  }
  func.func @transform_2(%arg0: i32, %arg1: i32) -> (i32, i32) {
    %c0_i32 = arith.constant 0 : i32
    %c0_i32_0 = arith.constant 0 : i32
    %c0_i32_1 = arith.constant 0 : i32
    return %c0_i32, %c0_i32_0 : i32, i32
  }
  func.func @transform_3(%arg0: i32, %arg1: i32) -> (i32, i32, i32) {
    %c0_i32 = arith.constant 0 : i32
    %c0_i32_0 = arith.constant 0 : i32
    return %arg0, %c0_i32, %arg1 : i32, i32, i32
  }
}

</mosaic_0001>

<bundles_post_ra>
// kernel: tpu_custom_call.1
= control target key start
LH: loop header
LB: loop body
LE: loop exit
PB: predicated region body
PF: predicated region fallthrough
CT: control target
= control target key end

     0   :  { %8 = vsyncpa [#allocation3], 0  ;;  %s675_s0 = inlined_call_operand.vmem [shape: f32[2,36,64], index: 0, kind: input, shape index: {}]   ;;  %s676_s1 = inlined_call_operand.vmem [shape: f32[8,36], index: 1, kind: input, shape index: {}]   ;;  %s677_s2 = inlined_call_operand.vmem [shape: f32[8,1], index: 2, kind: input, shape index: {}]   ;;  %s678_s3 = inlined_call_operand.hbm [shape: f32[2,8,64], index: 3, kind: output, shape index: {}]  }
   0x1   :  { %10 = vsyncpa [#allocation3 + $0x1], 0  ;;  %s570_s12 = smov 0   ;;  %s572_s13 = smov 0  }
   0x2   :  { %s574_s14 = smov 0   ;;  %s576_s15 = smov 0  }
   0x3   :  { %s578_s16 = smov 0   ;;  %s580_s17 = smov 0  }
   0x4 LB: > { %s376_s18 = sadd.s32 4294967295, %s544_s17   ;;  %s377_s19 = sadd.s32 4294967294, %s544_s17   ;;  %s544_s17 = sphi %s580_s17, %s16_s17   ;;  %s540_s16 = sphi %s578_s16, %s685_s16   ;;  %s536_s15 = sphi %s576_s15, %s684_s15   ;;  %s532_s14 = sphi %s574_s14, %s683_s14   ;;  %s528_s13 = sphi %s572_s13, %s682_s13   ;;  %s524_s12 = sphi %s570_s12, %s681_s12  }
   0x5   : > { %s28_s20 = sadd.s32 1, %s540_s16  ;;  %s107_s21 = sadd.s32 1, %s532_s14 }
   0x6   : > { %p30_p0 = scmp.ge.s32.totalorder %s28_s20, 2  ;;  %p117_p1 = scmp.ne.s32.totalorder %s532_s14, %s528_s13 }
   0x7   : > { %p118_p2 = scmp.eq.s32.totalorder %s376_s18, 1  ;;  %p123_p3 = scmp.ne.s32.totalorder %s528_s13, %s524_s12 }
   0x8   : > { %s687_s20 = smov (%p30_p0, %s28_s20), 0  ;;  %p124_p5 = scmp.eq.s32.totalorder %s377_s19, 1 }
   0x9   : > { %p610_p4 = por %p118_p2, %p117_p1  ;;  %s102_s23 = ssub.s32 %s540_s16, %s687_s20 }
   0xa   : > { %p380_p6 = scmp.ge.s32.totalorder %s544_s17, 1  ;;  %p105_p7 = scmp.eq.s32.totalorder %s102_s23, 0 }
   0xb   : > { %p617_p8 = por %p124_p5, %p123_p3  ;;  %p159_p9 = scmp.lt.s32.totalorder %s544_s17, 3 }
   0xc   : > { %s623_s25 = scalar_select %p105_p7, %s532_s14, %s107_s21  }
   0xd   : > { %p160_p10 = pnand %p380_p6, %p159_p9 }
   0xe   : > { %p186_p11 = scmp.lt.s32.totalorder (!%p160_p10), %s536_s15, 1  ;;  %s183_s8 = sand.u32 (!%p160_p10), 1, %s528_s13  }
   0xf   : > { %163 = sbr.rel (%p160_p10) target bundleno = 245 (0xf5), region = 32  ;;  %s381_s9 = sshll.u32 (!%p160_p10), %s183_s8, 3 }
  0x10   : > { %s386_s10 = sshll.u32 (!%p160_p10), %s536_s15, 7  ;;  %s185_s11 = scalar_lea.vmem (!%p160_p10), [#allocation2], %s381_s9 }
  0x11   : > { %s302_s18 = sshll.u32 (!%p160_p10), %s185_s11, 4  ;;  %s300_s23 = scalar_lea.hbm (!%p160_p10), %s678_s3, %s386_s10  ;;  %s303_s18 = int_to_ptr.vmem [resolvable:$true] %s302_s18 }
  0x12   : > { %s288_s26 = scalar_lea.sflag (!%p160_p10), [#allocation3], %s183_s8  ;;  %s468_s27 = scalar_lea.vmem (!%p160_p10), %s303_s18, 128 }
  0x13   : > { %p469_p12 = scmp.ne.s32.totalorder (!%p160_p10), %s303_s18, %s468_s27 }
  0x14   : > { %v546_v0 = vmov 0.0   ;;  %vm547_vm0 = vmmov 0   ;;  %v200_v1 = vld [vmem:[%s677_s2] sm:$0xff]  ;;  %s187_s28 = scalar_select %p186_p11, %s536_s15, 1  ;;  %v548_v2 = vmov 0   ;;  %vm210_vm1 = vcmask 1043456  }
  0x15   : > { %395 = vmatprep.subr.mxu0 %v546_v0  ;;  %405 = vmatprep.mubr.msk.f32.mxu0 %vm547_vm0, %v546_v0  ;;  %v194_v8 = vld [vmem:[%s676_s1] sm:$0xff]  ;;  %vm206_vm2 = vcmask 293888   ;;  %vm285_vm3 = vcmask 523264   ;;  %p470_p13 = pnand %p469_p12, %p610_p4 }
  0x16   : > { %467 = vset.pattern.permute.xlu0 %v548_v2  ;;  %s408_s29 = smul.u32 40, %s187_s28  ;;  %s549_s28 = smov [#allocation2]  }
  0x17   : > { %203 = vperm.xlu0 %467, %v200_v1   ;;  %p471_p0 = pneg %p470_p13  ;;  %s472_s15 = sshll.u32 %s549_s28, 4  ;;  %s473_s15 = int_to_ptr.vmem [resolvable:$false] %s472_s15 }
  0x18   : > { %s193_s5 = scalar_lea.vmem %s675_s0, %s408_s29  ;;  %s474_s29 = scalar_lea.vmem %s473_s15, 256 }
  0x19   : > { %v199_v3 = vld [vmem:[%s193_s5 + $0x20] sm:$0xf]  ;;  %v198_v4 = vld [vmem:[%s193_s5 + $0x18] sm:$0xff]  ;;  %v197_v5 = vld [vmem:[%s193_s5 + $0x10] sm:$0xff]  ;;  %p475_p1 = scmp.lt.s32.totalorder %s303_s18, %s473_s15  ;;  %p476_p2 = scmp.lt.s32.totalorder %s474_s29, %s468_s27 }
  0x1a   : > { %396 = vmatpush3.msk.msra.mxu0 %vm210_vm1, %v199_v3  ;;  %v196_v6 = vld [vmem:[%s193_s5 + $0x8] sm:$0xff]  ;;  %v195_v7 = vld [vmem:[%s193_s5] sm:$0xff] }
  0x1b   : > { %397 = vmatprep.subr.mxu0 %v546_v0  ;;  %p477_p3 = por %p476_p2, %p475_p1 }
  0x1c   : > { %398 = vmatpush3.msra.mxu0 %v198_v4 }
  0x1d   : > { %399 = vmatprep.subr.mxu0 %v546_v0  ;;  %p478_p5 = pnand %p477_p3, %p471_p0 }
  0x1e   : > { %400 = vmatpush3.msra.mxu0 %v197_v5 }
  0x1f   : > { %401 = vmatprep.subr.mxu0 %v546_v0 }
  0x20   : > { %402 = vmatpush3.msra.mxu0 %v196_v6 }
  0x21   : > { %403 = vmatprep.subr.mxu0 %v546_v0 }
  0x22   : > { %404 = vmatpush3.msra.mxu0 %v195_v7 }
  0x23   : > { %406 = vmatmul.mubr.msk.f32.vlgmr.msra.gmra.mxu0 %vm206_vm2, %v194_v8 }
  0x92   : > { %v204_v9 = vpop.permute.xlu0 %203 }
  0xe3   : > { %v280_v10 = vpop.f32.mrf.mxu0 }
  0xe4   : > { %v281_v11 = vadd.f32 %v280_v10, %v204_v9 }
  0xe5   : > { %v407_v12 = vpop.f32.mrf.mxu0 }
  0xe6   : > { %v284_v13 = vmax.f32 %v281_v11, 0.0 }
  0xe8   : > { %286 = vst.msk [vmem:[%s185_s11] sm:$0xff] %vm285_vm3, %v284_v13 }
  0xe9   : > { %481 = shalt.err (!%p478_p5)
}
  0xea   : > { %s482_s30 = scalar_lea.hbm %s300_s23, 128  ;;  %s486_s6 = scalar_lea.hbm %s678_s3, 256 }
  0xeb   : > { %p483_p6 = scmp.ne.s32.totalorder %s300_s23, %s482_s30  ;;  %p487_p10 = scmp.lt.s32.totalorder %s300_s23, %s678_s3 }
  0xec   : > { %p488_p11 = scmp.lt.s32.totalorder %s486_s6, %s482_s30 }
  0xed   : > { %p484_p7 = pnand %p483_p6, %p610_p4 }
  0xee   : > { %p489_p12 = por %p488_p11, %p487_p10 }
  0xef   : > { %p485_p9 = pneg %p484_p7 }
  0xf1   : > { %p490_p13 = pnand %p489_p12, %p485_p9 }
  0xf3   : > { %493 = shalt.err (!%p490_p13)
}
  0xf4   : > { %409 = dma.vmem_to_hbm [thread:$0]  (%p610_p4), %s303_s18, 128, %s300_s23, %s288_s26  }
  0xf5 PF: > { %p415_p0 = scmp.ge.s32.totalorder %s544_s17, 2  ;;  %s314_s9 = sand.u32 1, %s524_s12  }
  0xf6   : > { %s315_s10 = scalar_lea.sflag [#allocation3], %s314_s9 }
  0xf7   : > { %p412_p1 = pnand %p415_p0, %p617_p8 }
  0xf9   : > { %p413_p2 = pneg %p412_p1 }
  0xfb   : > { %519 = dma.done.wait (%p413_p2), %s315_s10, 128  }
  0xfc   : > { %521 = vsyncadd (%p413_p2), %s315_s10, 4294967168  ;;  %s16_s17 = sadd.s32 1, %s544_s17   ;;  %s681_s12 = smov %s528_s13 }
  0xfd   : > { %p13_p3 = scmp.ge.s32.totalorder %s16_s17, 4   ;;  %s682_s13 = smov %s532_s14 }
  0xfe   : > { %s683_s14 = smov %s623_s25  ;;  %s684_s15 = smov %s540_s16 }
  0xff   : > { %s685_s16 = smov %s687_s20  ;;  %15 = sbr.rel (!%p13_p3) target bundleno = 4 (0x4), region = 67 }
 0x104   :  { %320 = vsyncpa [#allocation3], 1 }
 0x105   :  { %322 = vsyncpa [#allocation3 + $0x1], 1 }

</bundles_post_ra>
